<compile_context>
chip_gen: v5e
topology: v5e:2x2
jax: 0.10.0
libtpu: 0.0.40
codegen_flags: <defaults>
</compile_context>

<pallas_src>
import numpy as np
import jax
import jax.numpy as jnp
from jax.experimental import pallas as pl
from jax.experimental.pallas import tpu as pltpu

LANE = 128


def _round_up(x, m):
    return ((x + m - 1) // m) * m


def _round_down(x, m):
    return (x // m) * m


def _sublane_align(dtype):
    # Minimum second-to-last tile dim: (8,128) for 4-byte, (16,128) for
    # 2-byte, (32,128) for 1-byte dtypes.
    itemsize = jnp.dtype(dtype).itemsize
    return max(8, 32 // max(1, itemsize))


def _vmem_capacity_bytes():
    try:
        return int(pltpu.get_tpu_info().vmem_capacity_bytes)
    except Exception:
        # Conservative fallback: v7x per-TensorCore VMEM.
        return 64 * 1024 * 1024


# ----------------------------------------------------------------------------
# Kernel
# ----------------------------------------------------------------------------
def _bias_kernel(x_ref, b_ref, o_ref):
    # (TB, TD) activation tile + (1, TD) bias row -> broadcast add in the
    # promoted (output) dtype.
    o_ref[...] = x_ref[...].astype(o_ref.dtype) + b_ref[...]


# ----------------------------------------------------------------------------
# Wrapper
# ----------------------------------------------------------------------------
def bias_layer_forward(x, bias, *, vmem_budget_bytes=None, donate_x=False):
    """BiasLayer.forward: y = x + bias.

    x:    (batch, dim)
    bias: (dim,)  -- learnable parameter of the module.
    """
    bs, D = x.shape
    assert bias.shape == (D,), (bias.shape, D)

    # Match the reference promotion semantics of `x + bias`.
    out_dtype = jnp.result_type(x.dtype, bias.dtype)
    bias2d = jnp.reshape(bias.astype(out_dtype), (1, D))

    itemsize_x = jnp.dtype(x.dtype).itemsize
    itemsize_o = jnp.dtype(out_dtype).itemsize
    # Tile must satisfy both the input and output dtype layouts.
    row_align = max(_sublane_align(x.dtype), _sublane_align(out_dtype))

    # --- VMEM budget (single source of truth) --------------------------------
    vmem_cap = _vmem_capacity_bytes()
    if vmem_budget_bytes is None:
        # ~25% of physical VMEM for the double-buffered pipeline tiles:
        # 32 MiB on v5e/v6e (128 MiB), 16 MiB on v7x (64 MiB per TC).
        budget = max(8 * 1024 * 1024, min(32 * 1024 * 1024, vmem_cap // 4))
    else:
        budget = min(int(vmem_budget_bytes), vmem_cap // 2)

    # --- Feature (lane) tile --------------------------------------------------
    # Full width when moderate; otherwise a large multiple of 128 so stores are
    # unmasked full-width vst's and the footprint is decoupled from D.
    max_lane_elems = 2048
    if D <= max_lane_elems:
        TD = D
    else:
        TD = _round_down(max_lane_elems, LANE)  # multiple of 128; tail masked
    nd = pl.cdiv(D, TD)

    # --- Batch (sublane) tile ---------------------------------------------------
    # Double-buffered input tile + double-buffered output tile per grid step.
    bytes_per_row = 2 * TD * itemsize_x + 2 * TD * itemsize_o
    max_rows = max(row_align, budget // bytes_per_row)
    if bs <= row_align:
        TB = bs  # full-extent block (legal even if unaligned)
    else:
        TB = min(int(max_rows), bs)
        # Guarantee >= 2 batch steps so megacore (v7x) has tiles to shard.
        TB = min(TB, _round_up(pl.cdiv(bs, 2), row_align))
        TB = max(row_align, _round_down(TB, row_align))
    nb = pl.cdiv(bs, TB)

    # --- vmem_limit derived from the chosen tiles ------------------------------
    tile_bytes = (2 * TB * TD * itemsize_x          # input double buffer
                  + 2 * TB * TD * itemsize_o        # output double buffer
                  + 2 * TD * itemsize_o)            # bias double buffer
    vmem_limit = int(min(3 * vmem_cap // 4,
                         max(16 * 1024 * 1024, tile_bytes + 4 * 1024 * 1024)))

    io_aliases = {}
    if donate_x and x.dtype == out_dtype:
        io_aliases = {0: 0}

    return pl.pallas_call(
        _bias_kernel,
        out_shape=jax.ShapeDtypeStruct((bs, D), out_dtype),
        grid=(nb, nd),
        in_specs=[
            pl.BlockSpec((TB, TD), lambda i, j: (i, j)),
            # Bias depends only on the feature block; VMEM-resident per column.
            pl.BlockSpec((1, TD), lambda i, j: (0, j)),
        ],
        out_specs=pl.BlockSpec((TB, TD), lambda i, j: (i, j)),
        input_output_aliases=io_aliases,
        compiler_params=pltpu.CompilerParams(
            # All tiles are independent -> both axes shardable across TCs.
            dimension_semantics=("parallel", "parallel"),
            vmem_limit_bytes=vmem_limit,
        ),
    )(x, bias2d)


# ----------------------------------------------------------------------------
# Pure-JAX reference (mirrors the PyTorch forward literally)
# ----------------------------------------------------------------------------
def reference_forward(x, bias):
    return x + bias


if __name__ == "__main__":
    key = jax.random.PRNGKey(0)
    k1, k2, k3, k4 = jax.random.split(key, 4)

    # Lane-dense main case: dim multiple of 128, batch split into >=2 tiles.
    batch, dim = 128, 256
    x = jax.random.normal(k1, (batch, dim), jnp.float32)
    # BiasLayer default init is init_val=0; use nonzero values so the kernel
    # math is actually exercised.
    bias = 0.1 * jax.random.normal(k2, (dim,), jnp.float32)

    out = jax.block_until_ready(bias_layer_forward(x, bias))
    ref = reference_forward(x, bias)
    assert out.shape == (batch, dim), out.shape
    assert out.dtype == ref.dtype, (out.dtype, ref.dtype)
    np.testing.assert_allclose(np.asarray(out), np.asarray(ref), rtol=1e-6, atol=1e-6)

    # Ragged-batch case: batch not a multiple of the tile -> last block's
    # padded rows are masked on writeback by Pallas.
    x2 = jax.random.normal(k3, (20, 384), jnp.float32)
    bias2 = jnp.linspace(-1.0, 1.0, 384, dtype=jnp.float32)
    out2 = jax.block_until_ready(bias_layer_forward(x2, bias2))
    np.testing.assert_allclose(np.asarray(out2), np.asarray(x2 + bias2),
                               rtol=1e-6, atol=1e-6)

    # Mixed-dtype case: bf16 activations + f32 learnable bias -> promoted f32
    # output, matching the reference `x + bias` semantics.
    x3 = jax.random.normal(k4, (32, 128), jnp.bfloat16)
    bias3 = jnp.linspace(-0.5, 0.5, 128, dtype=jnp.float32)
    out3 = jax.block_until_ready(bias_layer_forward(x3, bias3))
    ref3 = reference_forward(x3, bias3)
    assert out3.dtype == ref3.dtype, (out3.dtype, ref3.dtype)
    np.testing.assert_allclose(np.asarray(out3), np.asarray(ref3),
                               rtol=1e-2, atol=1e-2)

    print("KERNEL_OK")
</pallas_src>

<mosaic_0001>
module attributes {stable_mosaic.version = 11 : i64} {
  func.func @_bias_kernel(%arg0: i32, %arg1: i32, %arg2: memref<64x256xf32, #tpu.memory_space<vmem>>, %arg3: memref<1x256xf32, #tpu.memory_space<vmem>>, %arg4: memref<64x256xf32, #tpu.memory_space<vmem>>) attributes {dimension_semantics = [#tpu.dimension_semantics<parallel>, #tpu.dimension_semantics<parallel>], iteration_bounds = array<i64: 2, 1>, scalar_prefetch = 0 : i64, scratch_operands = 0 : i64, tpu.core_type = #tpu.core_type<tc>, window_params = [{transform_indices = @transform_0, window_bounds = array<i64: 64, 256>}, {transform_indices = @transform_1, window_bounds = array<i64: 1, 256>}, {transform_indices = @transform_2, window_bounds = array<i64: 64, 256>}]} {
    %c0 = arith.constant 0 : index
    %c0_0 = arith.constant 0 : index
    %0 = vector.load %arg2[%c0, %c0_0] : memref<64x256xf32, #tpu.memory_space<vmem>>, vector<64x256xf32>
    %c0_1 = arith.constant 0 : index
    %c0_2 = arith.constant 0 : index
    %1 = vector.load %arg3[%c0_1, %c0_2] : memref<1x256xf32, #tpu.memory_space<vmem>>, vector<1x256xf32>
    %2 = vector.broadcast %1 : vector<1x256xf32> to vector<64x256xf32>
    %3 = arith.addf %0, %2 : vector<64x256xf32>
    %c0_3 = arith.constant 0 : index
    %c0_4 = arith.constant 0 : index
    %4 = vector.load %arg4[%c0_3, %c0_4] : memref<64x256xf32, #tpu.memory_space<vmem>>, vector<64x256xf32>
    tpu.vector_store %arg4[%c0_3, %c0_4], %3 {strides = array<i32>} : memref<64x256xf32, #tpu.memory_space<vmem>>, vector<64x256xf32>,
    return
  }
  func.func @transform_0(%arg0: i32, %arg1: i32) -> (i32, i32) {
    %c0_i32 = arith.constant 0 : i32
    return %arg0, %arg1 : i32, i32
  }
  func.func @transform_1(%arg0: i32, %arg1: i32) -> (i32, i32) {
    %c0_i32 = arith.constant 0 : i32
    %c0_i32_0 = arith.constant 0 : i32
    return %c0_i32, %arg1 : i32, i32
  }
  func.func @transform_2(%arg0: i32, %arg1: i32) -> (i32, i32) {
    %c0_i32 = arith.constant 0 : i32
    return %arg0, %arg1 : i32, i32
  }
}

</mosaic_0001>

<bundles_post_ra>
// kernel: tpu_custom_call.1
= control target key start
LH: loop header
LB: loop body
LE: loop exit
PB: predicated region body
PF: predicated region fallthrough
CT: control target
= control target key end

     0   :  { %7 = vsyncpa [#allocation3], 0  ;;  %s838_s0 = inlined_call_operand.hbm [shape: f32[128,256], index: 0, kind: input, shape index: {}]   ;;  %s839_s1 = inlined_call_operand.hbm [shape: f32[1,256], index: 1, kind: input, shape index: {}]   ;;  %s840_s2 = inlined_call_operand.hbm [shape: f32[128,256], index: 2, kind: output, shape index: {}]  }
   0x1   :  { %9 = vsyncpa [#allocation3 + $0x1], 0 }
   0x2   :  { %10 = vsyncpa [#allocation6], 0 }
   0x3   :  { %11 = vsyncpa [#allocation4], 0 }
   0x4   :  { %13 = vsyncpa [#allocation4 + $0x1], 0  ;;  %s650_s9 = smov 0   ;;  %s652_s10 = smov 0  }
   0x5   :  { %s654_s11 = smov 0   ;;  %s656_s12 = smov 0  }
   0x6   :  { %s658_s13 = smov 0   ;;  %s660_s14 = smov 0  }
   0x7 LB: > { %s382_s15 = sadd.s32 4294967295, %s628_s14   ;;  %s383_s16 = sadd.s32 4294967294, %s628_s14   ;;  %s628_s14 = sphi %s660_s14, %s19_s14   ;;  %s624_s13 = sphi %s658_s13, %s852_s13   ;;  %s620_s12 = sphi %s656_s12, %s851_s12   ;;  %s616_s11 = sphi %s654_s11, %s850_s11   ;;  %s612_s10 = sphi %s652_s10, %s849_s10   ;;  %s608_s9 = sphi %s650_s9, %s848_s9  }
   0x8   : > { %s40_s17 = sadd.s32 1, %s616_s11  ;;  %p47_p0 = scmp.ne.s32.totalorder %s616_s11, %s612_s10 }
   0x9   : > { %p48_p1 = scmp.eq.s32.totalorder %s628_s14, 0  ;;  %p53_p2 = scmp.ne.s32.totalorder %s612_s10, %s608_s9 }
   0xa   : > { %p688_p3 = scmp.eq.s32.totalorder %s382_s15, 0  ;;  %p105_p4 = scmp.eq.s32.totalorder %s382_s15, 1 }
   0xb   : > { %p692_p5 = por %p48_p1, %p47_p0  ;;  %p111_p6 = scmp.eq.s32.totalorder %s383_s16, 1 }
   0xc   : > { %p698_p7 = por %p688_p3, %p53_p2  ;;  %p702_p8 = por %p105_p4, %p47_p0 }
   0xd   : > { %p706_p9 = por %p111_p6, %p53_p2  ;;  %p384_p10 = scmp.ge.s32.totalorder %s628_s14, 1 }
   0xe   : > { %p118_p11 = scmp.lt.s32.totalorder %s628_s14, 3  ;;  %s132_s25 = sshll.u32 %s839_s1, 4  ;;  %s133_s25 = int_to_ptr.hbm [resolvable:$true] %s132_s25 }
   0xf   : > { %s630_s27 = smov [#allocation5]   ;;  %p386_p13 = scmp.ge.s32.totalorder %s628_s14, 2 }
  0x10   : > { %p715_p12 = pnand %p384_p10, %p118_p11  ;;  %s134_s28 = sshll.u32 %s630_s27, 4  ;;  %s135_s28 = int_to_ptr.vmem [resolvable:$true] %s134_s28 }
  0x11   : > { %p426_p1 = scmp.lt.s32.totalorder %s628_s14, 2  ;;  %s31_s30 = sadd.s32 1, %s624_s13 }
  0x12   : > { %p413_p0 = pneg %p715_p12  ;;  %p33_p6 = scmp.ge.s32.totalorder %s31_s30, 2 }
  0x13   : > { %p727_p4 = pnand %p426_p1, %p692_p5  ;;  %s145_s3 = sand.u32 1, %s616_s11  }
  0x14   : > { %p414_p2 = pnand %p413_p0, %p688_p3  ;;  %s854_s30 = smov (%p33_p6, %s31_s30), 0 }
  0x15   : > { %s387_s4 = sshll.u32 %s145_s3, 7  ;;  %s35_s5 = ssub.s32 %s624_s13, %s854_s30 }
  0x16   : > { %416 = dma.hbm_to_vmem [thread:$0]  (!%p414_p2), %s133_s25, 32, %s135_s28, [#allocation6]  }
  0x17   : > { %p38_p10 = scmp.eq.s32.totalorder %s35_s5, 0  ;;  %s402_s6 = sshll.u32 %s624_s13, 7 }
  0x18   : > { %s157_s15 = scalar_lea.hbm %s838_s0, %s402_s6  ;;  %s149_s16 = scalar_lea.vmem [#allocation2], %s387_s4 }
  0x19   : > { %s160_s19 = sshll.u32 %s149_s16, 4  ;;  %s158_s24 = sshll.u32 %s157_s15, 4  ;;  %s161_s19 = int_to_ptr.vmem [resolvable:$true] %s160_s19  ;;  %s159_s24 = int_to_ptr.hbm [resolvable:$true] %s158_s24 }
  0x1a   : > { %s744_s23 = scalar_select %p38_p10, %s616_s11, %s40_s17  }
  0x1b   : > { %s146_s25 = scalar_lea.sflag [#allocation3], %s145_s3  ;;  %s631_s27 = smov 256  }
  0x1c   : > { %s632_s28 = smov 16   ;;  %172 = sbr.rel (%p715_p12) target bundleno = 61 (0x3d), region = 28 }
  0x1d   : > { %420 = dma.hbm_to_vmem [thread:$0]  (!%p727_p4), %s159_s24, 2048, %s161_s19, %s146_s25, %s631_s27, %s631_s27, %s632_s28  }
  0x1e   : > { %s751_s5 = sand.u32 (!%p715_p12), 1, %s612_s10  }
  0x1f   : > { %s392_s4 = sshll.u32 (!%p715_p12), %s751_s5, 7  ;;  %s175_s17 = scalar_lea.sflag (!%p715_p12), [#allocation3], %s751_s5 }
  0x20   : > { %s755_s6 = scalar_lea.vmem (!%p715_p12), [#allocation2], %s392_s4 }
  0x21   : > { %595 = dma.done.wait (%p698_p7), %s175_s17, 2048  }
  0x22   : > { %597 = vsyncadd (%p698_p7), %s175_s17, 4294965248 }
  0x23   : > { %599 = dma.done.wait (%p688_p3), [#allocation6], 32  }
  0x24   : > { %601 = vsyncadd (%p688_p3), [#allocation6], 4294967264  ;;  %v210_v0 = vld [vmem:[%s755_s6] sm:$0xff]  ;;  %v211_v2 = vld [vmem:[%s755_s6 + $0x8] sm:$0xff]  ;;  %s772_s18 = scalar_lea.vmem [#allocation7], %s392_s4  ;;  %s404_s20 = sshll.u32 %s620_s12, 7 }
  0x25   : > { %v226_v1 = vld [vmem:[#allocation5] sm:$0x3]  ;;  %v212_v5 = vld [vmem:[%s755_s6 + $0x10] sm:$0xff]  ;;  %v213_v6 = vld [vmem:[%s755_s6 + $0x18] sm:$0xff]  ;;  %s279_s3 = scalar_lea.hbm %s840_s2, %s404_s20  ;;  %s280_s12 = sshll.u32 %s772_s18, 4  ;;  %s281_s12 = int_to_ptr.vmem [resolvable:$true] %s280_s12 }
  0x26   : > { %v228_v3 = vperm.slane %v226_v1, 0  ;;  %v229_v4 = vperm.slane %v226_v1, 1  ;;  %v214_v7 = vld [vmem:[%s755_s6 + $0x20] sm:$0xff]  ;;  %v215_v11 = vld [vmem:[%s755_s6 + $0x28] sm:$0xff]  ;;  %v216_v13 = vld [vmem:[%s755_s6 + $0x30] sm:$0xff]  ;;  %s282_s7 = sshll.u32 %s279_s3, 4  ;;  %s283_s7 = int_to_ptr.hbm [resolvable:$true] %s282_s7 }
  0x27   : > { %v217_v15 = vld [vmem:[%s755_s6 + $0x38] sm:$0xff]  ;;  %v218_v17 = vld [vmem:[%s755_s6 + $0x40] sm:$0xff]  ;;  %v219_v19 = vld [vmem:[%s755_s6 + $0x48] sm:$0xff]  ;;  %s265_s8 = scalar_lea.sflag [#allocation4], %s751_s5  ;;  %s556_s15 = sshra.s32 %s283_s7, 4  ;;  %s557_s15 = int_to_ptr.hbm [resolvable:$true] %s556_s15 }
  0x28   : > { %v232_v8 = vadd.f32 %v228_v3, %v210_v0  ;;  %v233_v9 = vadd.f32 %v229_v4, %v211_v2  ;;  %v234_v10 = vadd.f32 %v228_v3, %v212_v5  ;;  %v235_v12 = vadd.f32 %v229_v4, %v213_v6  ;;  %v220_v21 = vld [vmem:[%s755_s6 + $0x50] sm:$0xff]  ;;  %v221_v23 = vld [vmem:[%s755_s6 + $0x58] sm:$0xff]  ;;  %v222_v25 = vld [vmem:[%s755_s6 + $0x60] sm:$0xff]  ;;  %s558_s16 = scalar_lea.hbm %s557_s15, 128  ;;  %s562_s25 = scalar_lea.hbm %s840_s2, 256 }
  0x29   : > { %v236_v14 = vadd.f32 %v228_v3, %v214_v7  ;;  %v237_v16 = vadd.f32 %v229_v4, %v215_v11  ;;  %v238_v18 = vadd.f32 %v228_v3, %v216_v13  ;;  %v239_v20 = vadd.f32 %v229_v4, %v217_v15  ;;  %v223_v27 = vld [vmem:[%s755_s6 + $0x68] sm:$0xff]  ;;  %v224_v29 = vld [vmem:[%s755_s6 + $0x70] sm:$0xff]  ;;  %v225_v31 = vld [vmem:[%s755_s6 + $0x78] sm:$0xff]  ;;  %p559_p3 = scmp.ne.s32.totalorder %s557_s15, %s558_s16  ;;  %p563_p11 = scmp.lt.s32.totalorder %s557_s15, %s840_s2 }
  0x2a   : > { %248 = vst [vmem:[%s772_s18] sm:$0xff] %v232_v8  ;;  %v240_v22 = vadd.f32 %v228_v3, %v218_v17  ;;  %v241_v24 = vadd.f32 %v229_v4, %v219_v19  ;;  %v242_v26 = vadd.f32 %v228_v3, %v220_v21  ;;  %v243_v28 = vadd.f32 %v229_v4, %v221_v23  ;;  %p564_p12 = scmp.lt.s32.totalorder %s562_s25, %s558_s16 }
  0x2b   : > { %249 = vst [vmem:[%s772_s18 + $0x8] sm:$0xff] %v233_v9  ;;  %v244_v30 = vadd.f32 %v228_v3, %v222_v25  ;;  %v245_v32 = vadd.f32 %v229_v4, %v223_v27  ;;  %v246_v33 = vadd.f32 %v228_v3, %v224_v29  ;;  %v247_v34 = vadd.f32 %v229_v4, %v225_v31  ;;  %p560_p5 = pnand %p559_p3, %p702_p8 }
  0x2c   : > { %250 = vst [vmem:[%s772_s18 + $0x10] sm:$0xff] %v234_v10  ;;  %p565_p0 = por %p564_p12, %p563_p11 }
  0x2d   : > { %251 = vst [vmem:[%s772_s18 + $0x18] sm:$0xff] %v235_v12  ;;  %p561_p7 = pneg %p560_p5 }
  0x2e   : > { %252 = vst [vmem:[%s772_s18 + $0x20] sm:$0xff] %v236_v14 }
  0x2f   : > { %253 = vst [vmem:[%s772_s18 + $0x28] sm:$0xff] %v237_v16  ;;  %p566_p1 = pnand %p565_p0, %p561_p7 }
  0x30   : > { %254 = vst [vmem:[%s772_s18 + $0x30] sm:$0xff] %v238_v18 }
  0x31   : > { %255 = vst [vmem:[%s772_s18 + $0x38] sm:$0xff] %v239_v20 }
  0x32   : > { %256 = vst [vmem:[%s772_s18 + $0x40] sm:$0xff] %v240_v22 }
  0x33   : > { %257 = vst [vmem:[%s772_s18 + $0x48] sm:$0xff] %v241_v24 }
  0x34   : > { %258 = vst [vmem:[%s772_s18 + $0x50] sm:$0xff] %v242_v26 }
  0x35   : > { %259 = vst [vmem:[%s772_s18 + $0x58] sm:$0xff] %v243_v28 }
  0x36   : > { %260 = vst [vmem:[%s772_s18 + $0x60] sm:$0xff] %v244_v30 }
  0x37   : > { %261 = vst [vmem:[%s772_s18 + $0x68] sm:$0xff] %v245_v32 }
  0x38   : > { %262 = vst [vmem:[%s772_s18 + $0x70] sm:$0xff] %v246_v33 }
  0x39   : > { %263 = vst [vmem:[%s772_s18 + $0x78] sm:$0xff] %v247_v34 }
  0x3a   : > { %569 = shalt.err (!%p566_p1)
}
  0x3b   : > { %s633_s5 = smov 256   ;;  %s634_s4 = smov 16  }
  0x3c   : > { %411 = dma.vmem_to_hbm [thread:$0]  (%p702_p8), %s281_s12, 2048, %s283_s7, %s265_s8, %s633_s5, %s633_s5, %s634_s4  }
  0x3d PF: > { %s297_s17 = sand.u32 1, %s608_s9   ;;  %p422_p2 = pnand %p386_p13, %p706_p9 }
  0x3e   : > { %s298_s6 = scalar_lea.sflag [#allocation4], %s297_s17 }
  0x3f   : > { %p423_p4 = pneg %p422_p2 }
  0x41   : > { %603 = dma.done.wait (%p423_p4), %s298_s6, 2048  }
  0x42   : > { %605 = vsyncadd (%p423_p4), %s298_s6, 4294965248  ;;  %s19_s14 = sadd.s32 1, %s628_s14   ;;  %s848_s9 = smov %s612_s10 }
  0x43   : > { %p16_p6 = scmp.ge.s32.totalorder %s19_s14, 4   ;;  %s849_s10 = smov %s616_s11 }
  0x44   : > { %s850_s11 = smov %s744_s23  ;;  %s851_s12 = smov %s624_s13 }
  0x45   : > { %s852_s13 = smov %s854_s30  ;;  %18 = sbr.rel (!%p16_p6) target bundleno = 7 (0x7), region = 78 }
  0x4a   :  { %304 = vsyncpa [#allocation3], 1 }
  0x4b   :  { %306 = vsyncpa [#allocation3 + $0x1], 1 }
  0x4c   :  { %307 = vsyncpa [#allocation6], 1 }
  0x4d   :  { %308 = vsyncpa [#allocation4], 1 }
  0x4e   :  { %310 = vsyncpa [#allocation4 + $0x1], 1 }

</bundles_post_ra>
